<compile_context>
chip_gen: v6e
topology: v6e:2x2x1
jax: 0.10.0
libtpu: 0.0.40
codegen_flags: <defaults>
</compile_context>

<pallas_src>
import functools
import math

import jax
import jax.numpy as jnp
from jax.experimental import pallas as pl
from jax.experimental.pallas import tpu as pltpu

_LANE = 128
_SUB = 32                 # sublane multiple safe for f32/bf16/int8 packed layouts
_MIB = 1024 * 1024


# ---------------------------------------------------------------------------
# Kernels
# ---------------------------------------------------------------------------

def _gap_packed_kernel(x_ref, p_ref, o_ref, *, inv_hw):
    # x_ref: (TM, G*hw) lane-dense tile holding G original rows per packed row.
    # p_ref: (G*hw, G) block-diagonal ones matrix -> segmented reduce on the MXU.
    acc = jnp.dot(x_ref[...], p_ref[...], preferred_element_type=jnp.float32)
    o_ref[...] = (acc * inv_hw).astype(o_ref.dtype)


def _gap_simple_kernel(x_ref, o_ref, *, inv_hw):
    # Full spatial extent per tile: single pass, no scratch, no predication.
    s = jnp.sum(x_ref[...], axis=-1, keepdims=True, dtype=jnp.float32)
    o_ref[...] = (s * inv_hw).astype(o_ref.dtype)


def _gap_chunked_kernel(x_ref, o_ref, acc_ref, *, hw, tk, inv_hw, need_mask):
    # Spatial axis chunked over grid axis 1 (reduction-last); f32 accumulator.
    k = pl.program_id(1)
    last = pl.num_programs(1) - 1

    @pl.when(k == 0)
    def _init():
        acc_ref[...] = jnp.zeros_like(acc_ref)

    if need_mask:
        # Only the final chunk extends past hw: mask there, accumulate raw elsewhere.
        @pl.when(k < last)
        def _body():
            acc_ref[...] += jnp.sum(x_ref[...], axis=-1, keepdims=True,
                                    dtype=jnp.float32)

        @pl.when(k == last)
        def _tail():
            x = x_ref[...]
            lane = jax.lax.broadcasted_iota(jnp.int32, x.shape, x.ndim - 1)
            x = jnp.where(k * tk + lane < hw, x, jnp.zeros_like(x))
            acc_ref[...] += jnp.sum(x, axis=-1, keepdims=True, dtype=jnp.float32)
    else:
        acc_ref[...] += jnp.sum(x_ref[...], axis=-1, keepdims=True,
                                dtype=jnp.float32)

    @pl.when(k == last)
    def _finalize():
        o_ref[...] = (acc_ref[...] * inv_hw).astype(o_ref.dtype)


# ---------------------------------------------------------------------------
# Tiling helpers
# ---------------------------------------------------------------------------

def _vmem_limit_bytes():
    """Generation-aware scoped-VMEM request (leave headroom on v7x's 64 MiB)."""
    cap = 128 * _MIB
    try:
        info = pltpu.get_tpu_info()
        cap = int(getattr(info, "vmem_capacity_bytes", cap) or cap)
    except Exception:
        pass
    return min(64 * _MIB, (cap * 3) // 4)   # v5e/v6e -> 64 MiB, v7x -> 48 MiB


def _row_tile(rows, tm_cap):
    """Rows per tile: big enough to amortize the ~0.35us step overhead,
    32-sublane aligned, and split >=2 ways whenever one tile would cover all
    rows (so v7x's two TensorCores both get work on the 'parallel' axis)."""
    if rows <= 2 * _SUB:
        return rows                              # tiny: one full-extent tile
    tm = min(rows, max(_SUB, tm_cap))
    if tm >= rows:                               # one tile would cover everything
        tm = pl.cdiv(rows, 2)                    # give the second TC a tile
    tm = max(_SUB, (tm // _SUB) * _SUB)
    return min(tm, rows)


# ---------------------------------------------------------------------------
# Path implementations
# ---------------------------------------------------------------------------

def _gap_packed(xf, N, C, G, lanes_p, inv_hw, itemsize, budget, limit):
    rows, hw = xf.shape
    rows_p = rows // G
    xp = xf.reshape(rows_p, lanes_p)             # contiguous reshape: free

    # Block-diagonal segmented-reduce matrix: P[l, g] = 1 iff l // hw == g.
    seg = jnp.arange(lanes_p, dtype=jnp.int32) // hw
    P = (seg[:, None] == jnp.arange(G, dtype=jnp.int32)[None, :]).astype(xf.dtype)

    tm = _row_tile(rows_p, max(1, budget // (2 * lanes_p * itemsize)))
    grid = (pl.cdiv(rows_p, tm),)

    out = pl.pallas_call(
        functools.partial(_gap_packed_kernel, inv_hw=inv_hw),
        out_shape=jax.ShapeDtypeStruct((rows_p, G), xf.dtype),
        grid_spec=pltpu.PrefetchScalarGridSpec(
            num_scalar_prefetch=0,
            grid=grid,
            in_specs=[
                pl.BlockSpec((tm, lanes_p), lambda i: (i, 0)),
                pl.BlockSpec((lanes_p, G), lambda i: (0, 0)),  # VMEM-resident constant
            ],
            out_specs=pl.BlockSpec((tm, G), lambda i: (i, 0)),
        ),
        compiler_params=pltpu.CompilerParams(
            dimension_semantics=("parallel",),
            vmem_limit_bytes=limit,
        ),
        cost_estimate=pl.CostEstimate(
            flops=2 * rows_p * lanes_p * G,
            transcendentals=0,
            bytes_accessed=(rows_p * lanes_p + lanes_p * G + rows_p * G) * itemsize,
        ),
    )(xp, P)
    return out.reshape(N, C)


def _gap_simple(xf, N, C, hw, inv_hw, itemsize, tm_cap, limit):
    rows = xf.shape[0]
    tm = _row_tile(rows, tm_cap)
    grid = (pl.cdiv(rows, tm),)

    out = pl.pallas_call(
        functools.partial(_gap_simple_kernel, inv_hw=inv_hw),
        out_shape=jax.ShapeDtypeStruct((rows, 1), xf.dtype),
        grid_spec=pltpu.PrefetchScalarGridSpec(
            num_scalar_prefetch=0,
            grid=grid,
            in_specs=[pl.BlockSpec((tm, hw), lambda i: (i, 0))],
            out_specs=pl.BlockSpec((tm, 1), lambda i: (i, 0)),
        ),
        compiler_params=pltpu.CompilerParams(
            dimension_semantics=("parallel",),
            vmem_limit_bytes=limit,
        ),
        cost_estimate=pl.CostEstimate(
            flops=rows * hw,
            transcendentals=0,
            bytes_accessed=rows * hw * itemsize + rows * itemsize,
        ),
    )(xf)
    return out.reshape(N, C)


def _gap_chunked(xf, N, C, hw, hw_pad, inv_hw, itemsize, budget, limit):
    rows = xf.shape[0]
    tm = _row_tile(rows, 256)
    tk_cap = max(_LANE, budget // (2 * max(tm, 1) * itemsize))
    tk = min((tk_cap // _LANE) * _LANE, hw_pad)
    if tk >= hw:
        # Whole spatial extent fits per tile after all -> simple path.
        return _gap_simple(xf, N, C, hw, inv_hw, itemsize,
                           max(1, budget // (2 * hw_pad * itemsize)), limit)

    kt = pl.cdiv(hw, tk)
    need_mask = (hw % tk) != 0
    grid = (pl.cdiv(rows, tm), kt)

    out = pl.pallas_call(
        functools.partial(_gap_chunked_kernel, hw=hw, tk=tk, inv_hw=inv_hw,
                          need_mask=need_mask),
        out_shape=jax.ShapeDtypeStruct((rows, 1), xf.dtype),
        grid_spec=pltpu.PrefetchScalarGridSpec(
            num_scalar_prefetch=0,
            grid=grid,
            in_specs=[pl.BlockSpec((tm, tk), lambda i, k: (i, k))],
            out_specs=pl.BlockSpec((tm, 1), lambda i, k: (i, 0)),
            scratch_shapes=[pltpu.VMEM((tm, 1), jnp.float32)],
        ),
        compiler_params=pltpu.CompilerParams(
            dimension_semantics=("parallel", "arbitrary"),
            vmem_limit_bytes=limit,
        ),
        cost_estimate=pl.CostEstimate(
            flops=rows * hw,
            transcendentals=0,
            bytes_accessed=rows * hw * itemsize + rows * itemsize,
        ),
    )(xf)
    return out.reshape(N, C)


# ---------------------------------------------------------------------------
# Public entry point
# ---------------------------------------------------------------------------

def global_avg_pool2d(x, *, vmem_budget_bytes=None):
    """x: (N, C, H, W) -> (N, C), mean over H and W (adaptive_avg_pool2d(x, 1))."""
    N, C, H, W = x.shape
    rows, hw = N * C, H * W
    itemsize = jnp.dtype(x.dtype).itemsize
    inv_hw = 1.0 / float(hw)

    limit = _vmem_limit_bytes()
    budget = vmem_budget_bytes
    if budget is None:
        # Double-buffered input-tile budget: ~40 MiB on v5e/v6e, ~24 MiB on v7x.
        budget = max(16 * _MIB, limit - 24 * _MIB)

    xf = x.reshape(rows, hw)

    # Path 1: lane-packed MXU segmented reduce (hw not a multiple of 128).
    G = _LANE // math.gcd(hw, _LANE)
    if G > 1 and rows % G == 0:
        lanes_p = G * hw                          # = lcm(hw, 128)
        rows_p = rows // G
        p_bytes = lanes_p * G * itemsize
        budget_packed = budget - 2 * p_bytes
        if (p_bytes <= 8 * _MIB
                and 2 * min(rows_p, 2 * _SUB) * lanes_p * itemsize <= budget_packed):
            return _gap_packed(xf, N, C, G, lanes_p, inv_hw, itemsize,
                               budget_packed, limit)

    # Path 2/3: row-tiled reduce, optionally chunking the spatial axis.
    hw_pad = pl.cdiv(hw, _LANE) * _LANE           # VMEM footprint counts padded lanes
    tm_cap = budget // (2 * hw_pad * itemsize)
    if tm_cap >= 2 * _SUB or tm_cap >= rows:
        return _gap_simple(xf, N, C, hw, inv_hw, itemsize, tm_cap, limit)
    return _gap_chunked(xf, N, C, hw, hw_pad, inv_hw, itemsize, budget, limit)


if __name__ == "__main__":
    key = jax.random.PRNGKey(0)

    # Primary check: shape consistent with the module's forward.
    N, C, H, W = 2, 4, 16, 16
    x = jax.random.normal(key, (N, C, H, W), dtype=jnp.float32)
    y = global_avg_pool2d(x)
    jax.block_until_ready(y)
    ref = jnp.mean(x, axis=(2, 3))
    assert y.shape == (N, C), y.shape
    assert jnp.allclose(y, ref, atol=1e-5, rtol=1e-5)

    # Non-lane-aligned spatial size, too few rows to pack -> simple path.
    x2 = jax.random.normal(jax.random.PRNGKey(1), (2, 4, 7, 7), dtype=jnp.float32)
    y2 = global_avg_pool2d(x2)
    jax.block_until_ready(y2)
    assert jnp.allclose(y2, jnp.mean(x2, axis=(2, 3)), atol=1e-5, rtol=1e-5)

    # Canonical ResNet-style pooling -> lane-packed MXU path (G = 128).
    x3 = jax.random.normal(jax.random.PRNGKey(2), (2, 64, 7, 7), dtype=jnp.float32)
    y3 = global_avg_pool2d(x3)
    jax.block_until_ready(y3)
    assert jnp.allclose(y3, jnp.mean(x3, axis=(2, 3)), atol=1e-5, rtol=1e-5)

    # Force the chunked (spatial-split) path with a tiny budget; exercises the
    # masked, Pallas-padded final chunk (900 % 128 != 0).
    x4 = jax.random.normal(jax.random.PRNGKey(3), (2, 24, 30, 30), dtype=jnp.float32)
    y4 = global_avg_pool2d(x4, vmem_budget_bytes=64 * 1024)
    jax.block_until_ready(y4)
    assert jnp.allclose(y4, jnp.mean(x4, axis=(2, 3)), atol=1e-5, rtol=1e-5)

    print("KERNEL_OK")
</pallas_src>

<mosaic_0001>
module attributes {stable_mosaic.version = 11 : i64} {
  func.func @_gap_simple_kernel(%arg0: i32, %arg1: memref<8x256xf32, #tpu.memory_space<vmem>>, %arg2: memref<8x1xf32, #tpu.memory_space<vmem>>) attributes {dimension_semantics = [#tpu.dimension_semantics<parallel>], iteration_bounds = array<i64: 1>, scalar_prefetch = 0 : i64, scratch_operands = 0 : i64, tpu.core_type = #tpu.core_type<tc>, window_params = [{transform_indices = @transform_0, window_bounds = array<i64: 8, 256>}, {transform_indices = @transform_1, window_bounds = array<i64: 8, 1>}]} {
    %c0 = arith.constant 0 : index
    %c0_0 = arith.constant 0 : index
    %0 = vector.load %arg1[%c0, %c0_0] : memref<8x256xf32, #tpu.memory_space<vmem>>, vector<8x256xf32>
    %cst = arith.constant dense<0.000000e+00> : vector<8xf32>
    %1 = vector.multi_reduction <add>, %0, %cst [1] : vector<8x256xf32> to vector<8xf32>
    %2 = vector.shape_cast %1 : vector<8xf32> to vector<8x1xf32>
    %cst_1 = arith.constant 3.906250e-03 : f32
    %3 = vector.broadcast %cst_1 : f32 to vector<8x1xf32>
    %4 = arith.mulf %2, %3 : vector<8x1xf32>
    %c0_2 = arith.constant 0 : index
    %c0_3 = arith.constant 0 : index
    %5 = vector.load %arg2[%c0_2, %c0_3] : memref<8x1xf32, #tpu.memory_space<vmem>>, vector<8x1xf32>
    tpu.vector_store %arg2[%c0_2, %c0_3], %4 {strides = array<i32>} : memref<8x1xf32, #tpu.memory_space<vmem>>, vector<8x1xf32>,
    return
  }
  func.func @transform_0(%arg0: i32) -> (i32, i32) {
    %c0_i32 = arith.constant 0 : i32
    %c0_i32_0 = arith.constant 0 : i32
    return %arg0, %c0_i32 : i32, i32
  }
  func.func @transform_1(%arg0: i32) -> (i32, i32) {
    %c0_i32 = arith.constant 0 : i32
    %c0_i32_0 = arith.constant 0 : i32
    return %arg0, %c0_i32 : i32, i32
  }
}

</mosaic_0001>

<bundles_post_ra>
// kernel: tpu_custom_call.1
= control target key start
LH: loop header
LB: loop body
LE: loop exit
PB: predicated region body
PF: predicated region fallthrough
CT: control target
= control target key end

     0   :  { %6 = vsyncpa [#allocation3], 0  ;;  %s56_s6 = smov [#allocation2]   ;;  %s73_s0 = inlined_call_operand.hbm [shape: f32[8,256], index: 0, kind: input, shape index: {}]   ;;  %s74_s1 = inlined_call_operand.vmem [shape: f32[8,1], index: 1, kind: output, shape index: {}]  }
   0x1   :  { %s13_s7 = sshll.u32 %s56_s6, 4  ;;  %s14_s7 = int_to_ptr.vmem [resolvable:$true] %s13_s7 }
   0x2   :  { %s42_s8 = scalar_lea.vmem %s14_s7, 256  ;;  %p47_p1 = scmp.lt.s32.totalorder %s14_s7, %s14_s7 }
   0x3   :  { %p43_p0 = scmp.ne.s32.totalorder %s14_s7, %s42_s8  ;;  %p48_p2 = scmp.lt.s32.totalorder %s42_s8, %s42_s8 }
   0x5   :  { %p49_p3 = por %p48_p2, %p47_p1 }
   0x7   :  { %p50_p4 = pnand %p49_p3, %p43_p0 }
   0x9   :  { %53 = shalt.err (!%p50_p4)
}
   0xa   :  { %16 = dma.hbm_to_vmem [thread:$0]  %s73_s0, 256, %s14_s7, [#allocation3]  }
   0xb   :  { %54 = dma.done.wait [#allocation3], 256  }
   0xc   :  { %55 = vsyncadd [#allocation3], 4294967040  ;;  %v20_v0 = vld [vmem:[#allocation2] sm:$0xff]  ;;  %v21_v1 = vld [vmem:[#allocation2 + $0x8] sm:$0xff]  ;;  %vm26_vm0 = vcmask 7168  }
   0xd   :  { %v22_v2 = vadd.f32 %v21_v1, %v20_v0 }
   0xf   :  { %23 = vadd.xlane.f32.xlu0 %v22_v2 }
  0x98   :  { %v24_v3 = vpop.xlane.xlu0 %23 }
  0x99   :  { %v25_v4 = vmul.f32 0.00390625, %v24_v3 }
  0x9b   :  { %27 = vst.msk [vmem:[%s74_s1] sm:$0xff] %vm26_vm0, %v25_v4 }
  0x9c   :  { %32 = vsyncpa [#allocation3], 1 }

</bundles_post_ra>
